<compile_context>
chip_gen: v6e
topology: v6e:2x2x1
jax: 0.10.0
libtpu: 0.0.40
codegen_flags: <defaults>
</compile_context>

<pallas_src>
import math

import jax
import jax.numpy as jnp
from jax.experimental import pallas as pl
from jax.experimental.pallas import tpu as pltpu

INPUT_DIM = 8    # F: number of fields
EMBED_DIM = 32   # D: embedding dim
N_LAYERS = 2     # number of self-attention interacting layers
BATCH = 2


def _autoint_kernel(x_ref, emb_ref, wqkv_ref, bqkv_ref, out_ref):
    # x_ref:    (TB, F)       batch tile of feature values (f32)
    # emb_ref:  (F, D)        embedding table (f32)
    # wqkv_ref: (L, D, 3D)    fused per-layer Q|K|V projection weights (bf16)
    # bqkv_ref: (L, 1, 3D)    fused per-layer Q|K|V biases (f32)
    # out_ref:  (TB, F*D)     lane-dense output tile (f32)
    F, D = emb_ref.shape
    TB = x_ref.shape[0]
    L = wqkv_ref.shape[0]

    x = x_ref[...]                                   # (TB, F)   f32
    emb = emb_ref[...]                               # (F, D)    f32
    out = x[:, :, None] * emb[None, :, :]            # (TB, F, D) f32, no transpose

    scale = 1.0 / math.sqrt(D)
    for l in range(L):                               # static unrolled layer loop
        w = wqkv_ref[l]                              # (D, 3D) bf16
        b = bqkv_ref[l]                              # (1, 3D) f32

        # Single fused projection: (TB*F, D) @ (D, 3D) -> (TB*F, 3D), f32 accum.
        qkv = jnp.dot(out.reshape(TB * F, D).astype(jnp.bfloat16), w,
                      preferred_element_type=jnp.float32) + b
        qkv = qkv.reshape(TB, F, 3 * D)
        q = qkv[:, :, :D]
        k = qkv[:, :, D:2 * D]
        v = qkv[:, :, 2 * D:]

        # Batched per-sample attention over fields (scores last dim = F).
        s = jnp.einsum('bfd,bgd->bfg',
                       q.astype(jnp.bfloat16), k.astype(jnp.bfloat16),
                       preferred_element_type=jnp.float32) * scale   # (TB, F, F)
        s = s - jnp.max(s, axis=-1, keepdims=True)
        p = jnp.exp(s)
        inv_l = pl.reciprocal(jnp.sum(p, axis=-1, keepdims=True), approx=True)
        attn = p * inv_l                                             # softmax, f32

        out = out + jnp.einsum('bfg,bgd->bfd',
                               attn.astype(jnp.bfloat16), v.astype(jnp.bfloat16),
                               preferred_element_type=jnp.float32)   # residual

    # Flatten (TB, F, D) -> (TB, F*D): lane-dense (256-wide) store.
    out_ref[...] = out.reshape(TB, F * D).astype(out_ref.dtype)


def autoint_feature_extractor(x, emb_w, wq, wk, wv, bq, bk, bv, *, block_b=512):
    """x: (B, F) float32 -> (B, F*D) float32."""
    B, F = x.shape
    D = emb_w.shape[1]
    L = wq.shape[0]

    # Fuse Q/K/V params; weights to bf16 (MXU inputs), biases stay f32.
    wqkv = jnp.concatenate([wq, wk, wv], axis=-1).astype(jnp.bfloat16)   # (L, D, 3D)
    bqkv = jnp.concatenate([bq, bk, bv], axis=-1).astype(jnp.float32)    # (L, 1, 3D)

    # Batch tile: TB samples per grid step (TB multiple of 8 when tiled).
    TB = min(block_b, B)
    n_blocks = -(-B // TB)
    B_pad = n_blocks * TB
    if B_pad != B:
        x = jnp.pad(x, ((0, B_pad - B), (0, 0)))

    out = pl.pallas_call(
        _autoint_kernel,
        out_shape=jax.ShapeDtypeStruct((B_pad, F * D), jnp.float32),
        grid=(n_blocks,),
        in_specs=[
            pl.BlockSpec((TB, F), lambda b: (b, 0)),            # x batch tile
            pl.BlockSpec((F, D), lambda b: (0, 0)),             # embedding table
            pl.BlockSpec((L, D, 3 * D), lambda b: (0, 0, 0)),   # fused Wqkv
            pl.BlockSpec((L, 1, 3 * D), lambda b: (0, 0, 0)),   # fused bqkv
        ],
        out_specs=pl.BlockSpec((TB, F * D), lambda b: (b, 0)),  # lane-dense out
        compiler_params=pltpu.CompilerParams(
            dimension_semantics=("parallel",)),
    )(x, emb_w, wqkv, bqkv)

    return out[:B]


def _reference(x, emb_w, wq, wk, wv, bq, bk, bv):
    """Pure-JAX f32 reference mirroring the PyTorch forward."""
    B, F = x.shape
    D = emb_w.shape[1]
    out = x[:, :, None] * emb_w[None, :, :]                    # (B, F, D)
    scale = 1.0 / math.sqrt(D)
    for l in range(wq.shape[0]):
        q = out @ wq[l] + bq[l]
        k = out @ wk[l] + bk[l]
        v = out @ wv[l] + bv[l]
        scores = jnp.einsum("bfd,bgd->bfg", q, k) * scale
        attn = jax.nn.softmax(scores, axis=-1)
        out = out + jnp.einsum("bfg,bgd->bfd", attn, v)
    return out.reshape(B, -1)


def _init_params(key, F, D, L):
    ks = jax.random.split(key, 7)
    emb_w = jax.random.normal(ks[0], (F, D), jnp.float32) * 0.1
    lim = 1.0 / math.sqrt(D)
    wq = jax.random.uniform(ks[1], (L, D, D), jnp.float32, -lim, lim)
    wk = jax.random.uniform(ks[2], (L, D, D), jnp.float32, -lim, lim)
    wv = jax.random.uniform(ks[3], (L, D, D), jnp.float32, -lim, lim)
    bq = jax.random.uniform(ks[4], (L, 1, D), jnp.float32, -lim, lim)
    bk = jax.random.uniform(ks[5], (L, 1, D), jnp.float32, -lim, lim)
    bv = jax.random.uniform(ks[6], (L, 1, D), jnp.float32, -lim, lim)
    return emb_w, wq, wk, wv, bq, bk, bv


if __name__ == "__main__":
    key = jax.random.PRNGKey(0)
    k_x, k_p, k_x2 = jax.random.split(key, 3)

    params = _init_params(k_p, INPUT_DIM, EMBED_DIM, N_LAYERS)

    # Small demo batch (single grid step; whole batch in one invocation).
    x = jax.random.normal(k_x, (BATCH, INPUT_DIM), jnp.float32)
    out = autoint_feature_extractor(x, *params)
    out = jax.block_until_ready(out)
    ref = _reference(x, *params)
    assert out.shape == (BATCH, INPUT_DIM * EMBED_DIM), out.shape
    assert jnp.allclose(out, ref, rtol=2e-2, atol=2e-2), float(
        jnp.max(jnp.abs(out - ref)))

    # Exercise the batch-tiled multi-step grid + padding path.
    x2 = jax.random.normal(k_x2, (20, INPUT_DIM), jnp.float32)
    out2 = autoint_feature_extractor(x2, *params, block_b=16)
    out2 = jax.block_until_ready(out2)
    ref2 = _reference(x2, *params)
    assert out2.shape == (20, INPUT_DIM * EMBED_DIM), out2.shape
    assert jnp.allclose(out2, ref2, rtol=2e-2, atol=2e-2), float(
        jnp.max(jnp.abs(out2 - ref2)))

    print("KERNEL_OK")
</pallas_src>

<mosaic_0001>
module attributes {stable_mosaic.version = 11 : i64} {
  func.func @_autoint_kernel(%arg0: i32, %arg1: memref<2x8xf32, #tpu.memory_space<vmem>>, %arg2: memref<8x32xf32, #tpu.memory_space<vmem>>, %arg3: memref<2x32x96xbf16, #tpu.memory_space<vmem>>, %arg4: memref<2x1x96xf32, #tpu.memory_space<vmem>>, %arg5: memref<2x256xf32, #tpu.memory_space<vmem>>) attributes {dimension_semantics = [#tpu.dimension_semantics<parallel>], iteration_bounds = array<i64: 1>, scalar_prefetch = 0 : i64, scratch_operands = 0 : i64, tpu.core_type = #tpu.core_type<tc>, window_params = [{transform_indices = @transform_0, window_bounds = array<i64: 2, 8>}, {pipeline_mode = #tpu.pipeline_mode<synchronous>, transform_indices = @transform_1, window_bounds = array<i64: 8, 32>}, {pipeline_mode = #tpu.pipeline_mode<synchronous>, transform_indices = @transform_2, window_bounds = array<i64: 2, 32, 96>}, {pipeline_mode = #tpu.pipeline_mode<synchronous>, transform_indices = @transform_3, window_bounds = array<i64: 2, 1, 96>}, {transform_indices = @transform_4, window_bounds = array<i64: 2, 256>}]} {
    %c0 = arith.constant 0 : index
    %c0_0 = arith.constant 0 : index
    %0 = vector.load %arg1[%c0, %c0_0] : memref<2x8xf32, #tpu.memory_space<vmem>>, vector<2x8xf32>
    %c0_1 = arith.constant 0 : index
    %c0_2 = arith.constant 0 : index
    %1 = vector.load %arg2[%c0_1, %c0_2] : memref<8x32xf32, #tpu.memory_space<vmem>>, vector<8x32xf32>
    %2 = vector.shape_cast %0 : vector<2x8xf32> to vector<2x8x1xf32>
    %3 = vector.shape_cast %1 : vector<8x32xf32> to vector<1x8x32xf32>
    %4 = vector.broadcast %2 : vector<2x8x1xf32> to vector<2x8x32xf32>
    %5 = vector.broadcast %3 : vector<1x8x32xf32> to vector<2x8x32xf32>
    %6 = arith.mulf %4, %5 : vector<2x8x32xf32>
    %c0_3 = arith.constant 0 : index
    %c0_4 = arith.constant 0 : index
    %c0_5 = arith.constant 0 : index
    %7 = vector.load %arg3[%c0_3, %c0_4, %c0_5] : memref<2x32x96xbf16, #tpu.memory_space<vmem>>, vector<1x32x96xbf16>
    %8 = vector.shape_cast %7 : vector<1x32x96xbf16> to vector<32x96xbf16>
    %c0_6 = arith.constant 0 : index
    %c0_7 = arith.constant 0 : index
    %c0_8 = arith.constant 0 : index
    %9 = vector.load %arg4[%c0_6, %c0_7, %c0_8] : memref<2x1x96xf32, #tpu.memory_space<vmem>>, vector<1x1x96xf32>
    %10 = vector.shape_cast %9 : vector<1x1x96xf32> to vector<1x96xf32>
    %11 = vector.shape_cast %6 : vector<2x8x32xf32> to vector<16x32xf32>
    %12 = arith.truncf %11 : vector<16x32xf32> to vector<16x32xbf16>
    %cst = arith.constant dense<0.000000e+00> : vector<16x96xf32>
    %13 = tpu.matmul %12, %8, %cst {dimension_numbers = #tpu.dot_dimension_numbers<[1], [0], [0], [1], [0, 0, 1, 1], [], []>} : vector<16x32xbf16>, vector<32x96xbf16>, vector<16x96xf32> -> vector<16x96xf32>
    %14 = vector.broadcast %10 : vector<1x96xf32> to vector<16x96xf32>
    %15 = arith.addf %13, %14 : vector<16x96xf32>
    %16 = vector.shape_cast %15 : vector<16x96xf32> to vector<2x8x96xf32>
    %17 = vector.extract_strided_slice %16 {offsets = [0, 0, 0], sizes = [2, 8, 32], strides = [1, 1, 1]} : vector<2x8x96xf32> to vector<2x8x32xf32>
    %18 = vector.extract_strided_slice %16 {offsets = [0, 0, 32], sizes = [2, 8, 32], strides = [1, 1, 1]} : vector<2x8x96xf32> to vector<2x8x32xf32>
    %19 = vector.extract_strided_slice %16 {offsets = [0, 0, 64], sizes = [2, 8, 32], strides = [1, 1, 1]} : vector<2x8x96xf32> to vector<2x8x32xf32>
    %20 = arith.truncf %17 : vector<2x8x32xf32> to vector<2x8x32xbf16>
    %21 = arith.truncf %18 : vector<2x8x32xf32> to vector<2x8x32xbf16>
    "tpu.trace_start"() <{level = 10 : i32, message = "bfd,bgd->bfg"}> : () -> ()
    %cst_9 = arith.constant dense<0.000000e+00> : vector<2x8x8xf32>
    %22 = tpu.matmul %20, %21, %cst_9 {dimension_numbers = #tpu.dot_dimension_numbers<[2], [2], [1], [1], [0, 0, 0, 1, 1, 1], [0], [0]>} : vector<2x8x32xbf16>, vector<2x8x32xbf16>, vector<2x8x8xf32> -> vector<2x8x8xf32>
    "tpu.trace_stop"() : () -> ()
    %cst_10 = arith.constant 0.176776692 : f32
    %23 = vector.broadcast %cst_10 : f32 to vector<2x8x8xf32>
    %24 = arith.mulf %22, %23 : vector<2x8x8xf32>
    %cst_11 = arith.constant dense<0xFF800000> : vector<2x8xf32>
    %25 = vector.multi_reduction <maximumf>, %24, %cst_11 [2] : vector<2x8x8xf32> to vector<2x8xf32>
    %26 = vector.shape_cast %25 : vector<2x8xf32> to vector<2x8x1xf32>
    %27 = vector.broadcast %26 : vector<2x8x1xf32> to vector<2x8x8xf32>
    %28 = arith.subf %24, %27 : vector<2x8x8xf32>
    %29 = math.exp %28 : vector<2x8x8xf32>
    %cst_12 = arith.constant dense<0.000000e+00> : vector<2x8xf32>
    %30 = vector.multi_reduction <add>, %29, %cst_12 [2] : vector<2x8x8xf32> to vector<2x8xf32>
    %31 = vector.shape_cast %30 : vector<2x8xf32> to vector<2x8x1xf32>
    %32 = tpu.reciprocal %31 {approx = true} : vector<2x8x1xf32> -> vector<2x8x1xf32>
    %33 = vector.broadcast %32 : vector<2x8x1xf32> to vector<2x8x8xf32>
    %34 = arith.mulf %29, %33 : vector<2x8x8xf32>
    %35 = arith.truncf %34 : vector<2x8x8xf32> to vector<2x8x8xbf16>
    %36 = arith.truncf %19 : vector<2x8x32xf32> to vector<2x8x32xbf16>
    "tpu.trace_start"() <{level = 10 : i32, message = "bfg,bgd->bfd"}> : () -> ()
    %cst_13 = arith.constant dense<0.000000e+00> : vector<2x8x32xf32>
    %37 = tpu.matmul %35, %36, %cst_13 {dimension_numbers = #tpu.dot_dimension_numbers<[2], [1], [1], [2], [0, 0, 0, 1, 1, 2], [0], [0]>} : vector<2x8x8xbf16>, vector<2x8x32xbf16>, vector<2x8x32xf32> -> vector<2x8x32xf32>
    "tpu.trace_stop"() : () -> ()
    %38 = arith.addf %6, %37 : vector<2x8x32xf32>
    %c1 = arith.constant 1 : index
    %c0_14 = arith.constant 0 : index
    %c0_15 = arith.constant 0 : index
    %39 = vector.load %arg3[%c1, %c0_14, %c0_15] : memref<2x32x96xbf16, #tpu.memory_space<vmem>>, vector<1x32x96xbf16>
    %40 = vector.shape_cast %39 : vector<1x32x96xbf16> to vector<32x96xbf16>
    %c1_16 = arith.constant 1 : index
    %c0_17 = arith.constant 0 : index
    %c0_18 = arith.constant 0 : index
    %41 = vector.load %arg4[%c1_16, %c0_17, %c0_18] : memref<2x1x96xf32, #tpu.memory_space<vmem>>, vector<1x1x96xf32>
    %42 = vector.shape_cast %41 : vector<1x1x96xf32> to vector<1x96xf32>
    %43 = vector.shape_cast %38 : vector<2x8x32xf32> to vector<16x32xf32>
    %44 = arith.truncf %43 : vector<16x32xf32> to vector<16x32xbf16>
    %cst_19 = arith.constant dense<0.000000e+00> : vector<16x96xf32>
    %45 = tpu.matmul %44, %40, %cst_19 {dimension_numbers = #tpu.dot_dimension_numbers<[1], [0], [0], [1], [0, 0, 1, 1], [], []>} : vector<16x32xbf16>, vector<32x96xbf16>, vector<16x96xf32> -> vector<16x96xf32>
    %46 = vector.broadcast %42 : vector<1x96xf32> to vector<16x96xf32>
    %47 = arith.addf %45, %46 : vector<16x96xf32>
    %48 = vector.shape_cast %47 : vector<16x96xf32> to vector<2x8x96xf32>
    %49 = vector.extract_strided_slice %48 {offsets = [0, 0, 0], sizes = [2, 8, 32], strides = [1, 1, 1]} : vector<2x8x96xf32> to vector<2x8x32xf32>
    %50 = vector.extract_strided_slice %48 {offsets = [0, 0, 32], sizes = [2, 8, 32], strides = [1, 1, 1]} : vector<2x8x96xf32> to vector<2x8x32xf32>
    %51 = vector.extract_strided_slice %48 {offsets = [0, 0, 64], sizes = [2, 8, 32], strides = [1, 1, 1]} : vector<2x8x96xf32> to vector<2x8x32xf32>
    %52 = arith.truncf %49 : vector<2x8x32xf32> to vector<2x8x32xbf16>
    %53 = arith.truncf %50 : vector<2x8x32xf32> to vector<2x8x32xbf16>
    "tpu.trace_start"() <{level = 10 : i32, message = "bfd,bgd->bfg"}> : () -> ()
    %cst_20 = arith.constant dense<0.000000e+00> : vector<2x8x8xf32>
    %54 = tpu.matmul %52, %53, %cst_20 {dimension_numbers = #tpu.dot_dimension_numbers<[2], [2], [1], [1], [0, 0, 0, 1, 1, 1], [0], [0]>} : vector<2x8x32xbf16>, vector<2x8x32xbf16>, vector<2x8x8xf32> -> vector<2x8x8xf32>
    "tpu.trace_stop"() : () -> ()
    %cst_21 = arith.constant 0.176776692 : f32
    %55 = vector.broadcast %cst_21 : f32 to vector<2x8x8xf32>
    %56 = arith.mulf %54, %55 : vector<2x8x8xf32>
    %cst_22 = arith.constant dense<0xFF800000> : vector<2x8xf32>
    %57 = vector.multi_reduction <maximumf>, %56, %cst_22 [2] : vector<2x8x8xf32> to vector<2x8xf32>
    %58 = vector.shape_cast %57 : vector<2x8xf32> to vector<2x8x1xf32>
    %59 = vector.broadcast %58 : vector<2x8x1xf32> to vector<2x8x8xf32>
    %60 = arith.subf %56, %59 : vector<2x8x8xf32>
    %61 = math.exp %60 : vector<2x8x8xf32>
    %cst_23 = arith.constant dense<0.000000e+00> : vector<2x8xf32>
    %62 = vector.multi_reduction <add>, %61, %cst_23 [2] : vector<2x8x8xf32> to vector<2x8xf32>
    %63 = vector.shape_cast %62 : vector<2x8xf32> to vector<2x8x1xf32>
    %64 = tpu.reciprocal %63 {approx = true} : vector<2x8x1xf32> -> vector<2x8x1xf32>
    %65 = vector.broadcast %64 : vector<2x8x1xf32> to vector<2x8x8xf32>
    %66 = arith.mulf %61, %65 : vector<2x8x8xf32>
    %67 = arith.truncf %66 : vector<2x8x8xf32> to vector<2x8x8xbf16>
    %68 = arith.truncf %51 : vector<2x8x32xf32> to vector<2x8x32xbf16>
    "tpu.trace_start"() <{level = 10 : i32, message = "bfg,bgd->bfd"}> : () -> ()
    %cst_24 = arith.constant dense<0.000000e+00> : vector<2x8x32xf32>
    %69 = tpu.matmul %67, %68, %cst_24 {dimension_numbers = #tpu.dot_dimension_numbers<[2], [1], [1], [2], [0, 0, 0, 1, 1, 2], [0], [0]>} : vector<2x8x8xbf16>, vector<2x8x32xbf16>, vector<2x8x32xf32> -> vector<2x8x32xf32>
    "tpu.trace_stop"() : () -> ()
    %70 = arith.addf %38, %69 : vector<2x8x32xf32>
    %71 = vector.shape_cast %70 : vector<2x8x32xf32> to vector<2x256xf32>
    %c0_25 = arith.constant 0 : index
    %c0_26 = arith.constant 0 : index
    %72 = vector.load %arg5[%c0_25, %c0_26] : memref<2x256xf32, #tpu.memory_space<vmem>>, vector<2x256xf32>
    tpu.vector_store %arg5[%c0_25, %c0_26], %71 {strides = array<i32>} : memref<2x256xf32, #tpu.memory_space<vmem>>, vector<2x256xf32>,
    return
  }
  func.func @transform_0(%arg0: i32) -> (i32, i32) {
    %c0_i32 = arith.constant 0 : i32
    %c0_i32_0 = arith.constant 0 : i32
    return %arg0, %c0_i32 : i32, i32
  }
  func.func @transform_1(%arg0: i32) -> (i32, i32) {
    %c0_i32 = arith.constant 0 : i32
    %c0_i32_0 = arith.constant 0 : i32
    %c0_i32_1 = arith.constant 0 : i32
    return %c0_i32, %c0_i32_0 : i32, i32
  }
  func.func @transform_2(%arg0: i32) -> (i32, i32, i32) {
    %c0_i32 = arith.constant 0 : i32
    %c0_i32_0 = arith.constant 0 : i32
    %c0_i32_1 = arith.constant 0 : i32
    %c0_i32_2 = arith.constant 0 : i32
    return %c0_i32, %c0_i32_0, %c0_i32_1 : i32, i32, i32
  }
  func.func @transform_3(%arg0: i32) -> (i32, i32, i32) {
    %c0_i32 = arith.constant 0 : i32
    %c0_i32_0 = arith.constant 0 : i32
    %c0_i32_1 = arith.constant 0 : i32
    %c0_i32_2 = arith.constant 0 : i32
    return %c0_i32, %c0_i32_0, %c0_i32_1 : i32, i32, i32
  }
  func.func @transform_4(%arg0: i32) -> (i32, i32) {
    %c0_i32 = arith.constant 0 : i32
    %c0_i32_0 = arith.constant 0 : i32
    return %arg0, %c0_i32 : i32, i32
  }
}

</mosaic_0001>

<bundles_post_ra>
// kernel: tpu_custom_call.1
= control target key start
LH: loop header
LB: loop body
LE: loop exit
PB: predicated region body
PF: predicated region fallthrough
CT: control target
= control target key end

     0   :  { %9 = vsyncpa [#allocation3], 0  ;;  %s1168_s0 = inlined_call_operand.hbm [shape: f32[2,8], index: 0, kind: input, shape index: {}]   ;;  %s1169_s1 = inlined_call_operand.hbm [shape: f32[8,32], index: 1, kind: input, shape index: {}]   ;;  %s1170_s2 = inlined_call_operand.hbm [shape: bf16[2,32,96], index: 2, kind: input, shape index: {}]   ;;  %s1171_s3 = inlined_call_operand.vmem [shape: f32[2,1,96], index: 3, kind: input, shape index: {}]   ;;  %s1172_s4 = inlined_call_operand.hbm [shape: f32[2,256], index: 4, kind: output, shape index: {}]  }
   0x1   :  { %10 = vsyncpa [#allocation6], 0 }
   0x2   :  { %11 = vsyncpa [#allocation4], 0  ;;  %s1011_s15 = smov [#allocation5]   ;;  %s1012_s17 = smov [#allocation2]  }
   0x3   :  { %s28_s16 = sshll.u32 %s1011_s15, 4  ;;  %s18_s18 = sshll.u32 %s1012_s17, 4  ;;  %s29_s16 = int_to_ptr.vmem [resolvable:$true] %s28_s16  ;;  %s19_s18 = int_to_ptr.vmem [resolvable:$true] %s18_s18 }
   0x4   :  { %s933_s19 = scalar_lea.vmem %s29_s16, 128  ;;  %p938_p1 = scmp.lt.s32.totalorder %s29_s16, %s29_s16 }
   0x5   :  { %p934_p0 = scmp.ne.s32.totalorder %s29_s16, %s933_s19  ;;  %p939_p2 = scmp.lt.s32.totalorder %s933_s19, %s933_s19 }
   0x7   :  { %p940_p3 = por %p939_p2, %p938_p1 }
   0x9   :  { %p941_p4 = pnand %p940_p3, %p934_p0 }
   0xb   :  { %944 = shalt.err (!%p941_p4)
}
   0xc   :  { %31 = dma.hbm_to_vmem [thread:$0]  %s1169_s1, 128, %s29_s16, [#allocation6]  }
   0xd   :  { %s953_s22 = scalar_lea.vmem %s19_s18, 32  ;;  %p958_p6 = scmp.lt.s32.totalorder %s19_s18, %s19_s18 }
   0xe   :  { %p954_p5 = scmp.ne.s32.totalorder %s19_s18, %s953_s22  ;;  %p959_p7 = scmp.lt.s32.totalorder %s953_s22, %s953_s22 }
  0x10   :  { %p960_p8 = por %p959_p7, %p958_p6 }
  0x12   :  { %p961_p9 = pnand %p960_p8, %p954_p5 }
  0x14   :  { %964 = shalt.err (!%p961_p9)
}
  0x15   :  { %21 = dma.hbm_to_vmem [thread:$0]  %s1168_s0, 32, %s19_s18, [#allocation3]  }
  0x16   :  { %s1013_s25 = smov [#allocation7]  }
  0x17   :  { %s37_s26 = sshll.u32 %s1013_s25, 4  ;;  %s38_s26 = int_to_ptr.vmem [resolvable:$true] %s37_s26 }
  0x18   :  { %s973_s27 = scalar_lea.vmem %s38_s26, 512  ;;  %p978_p11 = scmp.lt.s32.totalorder %s38_s26, %s38_s26 }
  0x19   :  { %p974_p10 = scmp.ne.s32.totalorder %s38_s26, %s973_s27  ;;  %p979_p12 = scmp.lt.s32.totalorder %s973_s27, %s973_s27 }
  0x1b   :  { %p980_p13 = por %p979_p12, %p978_p11 }
  0x1d   :  { %p981_p0 = pnand %p980_p13, %p974_p10 }
  0x1f   :  { %984 = shalt.err (!%p981_p0)
}
  0x20   :  { %s1014_s1 = smov 64   ;;  %s1015_s28 = smov 4  }
  0x21   :  { %43 = dma.hbm_to_vmem [thread:$0]  %s1170_s2, 512, %s38_s26, [#allocation6], %s1014_s1, %s1014_s1, %s1015_s28  }
  0x22   :  { %1005 = dma.done.wait [#allocation3], 32  }
  0x23   :  { %1006 = vsyncadd [#allocation3], 4294967264 }
  0x24   :  { %1007 = dma.done.wait [#allocation6], 640  }
  0x25   :  { %1008 = vsyncadd [#allocation6], 4294966656  ;;  %v58_v0 = vlaneseq  ;;  %v1016_v1 = vmov 0.0   ;;  %vm1017_vm0 = vmmov 0   ;;  %v56_v5 = vld [vmem:[#allocation2] sm:$0x3] }
  0x26   :  { %829 = vmatprep.subr.bf16.mxu0 %v1016_v1  ;;  %837 = vmatprep.subr.bf16.mxu1 %v1016_v1  ;;  %v905_v7 = vld [vmem:[#allocation7 + $0x8] sm:$0xff]   ;;  %v906_v9 = vld [vmem:[#allocation7] sm:$0xff]   ;;  %v57_v11 = vld [vmem:[#allocation5] sm:$0xff]  ;;  %vm98_vm1 = vcmask 261120   ;;  %s1018_s5 = smov 96   ;;  %vm245_vm2 = vcmask 64512  }
  0x27   :  { %v1061_v2 = vshrl.u32 %v58_v0, 7  ;;  %833 = vmatprep.mubr.msk.bf16.mxu0 %vm1017_vm0, %v1016_v1  ;;  %839 = vmatprep.mubr.msk.bf16.mxu1 %vm1017_vm0, %v1016_v1  ;;  %v789_v16 = vld [vmem:[%s1171_s3] ss:$0 sm:$0xff]  ;;  %vm275_vm3 = vcmask 1043456   ;;  %v907_v63 = vld [vmem:[#allocation7 + $0x18] sm:$0xff]   ;;  %vm754_vm4 = vcmask 523264  }
  0x28   :  { %830 = vmatpush3.bf16.msra.mxu0 %v905_v7  ;;  %v908_v0 = vld [vmem:[#allocation7 + $0x10] sm:$0xff]   ;;  %vm756_vm5 = vcmask 785408   ;;  %s1022_s8 = smov [#allocation8]  }
  0x29   :  { %v60_v3 = vsub.s32 0, %v1061_v2  ;;  %v67_v4 = vsub.s32 1, %v1061_v2  ;;  %831 = vmatprep.subr.bf16.mxu0 %v1016_v1  ;;  %s779_s9 = sshll.u32 %s1022_s8, 4  ;;  %s780_s9 = int_to_ptr.vmem [resolvable:$true] %s779_s9 }
  0x2a   :  { %s985_s10 = scalar_lea.vmem %s780_s9, 64  ;;  %p990_p2 = scmp.lt.s32.totalorder %s780_s9, %s780_s9 }
  0x2b   :  { %v61_v6 = vrot.slane %v56_v5, %v60_v3  ;;  %v68_v8 = vrot.slane %v56_v5, %v67_v4  ;;  %p986_p1 = scmp.ne.s32.totalorder %s780_s9, %s985_s10  ;;  %p991_p3 = scmp.lt.s32.totalorder %s985_s10, %s985_s10 }
  0x2c   :  { %832 = vmatpush3.bf16.msra.mxu0 %v906_v9 }
  0x2d   :  { %63 = vbcast.lane.b32.xlu0 %v61_v6, 256  ;;  %843 = vmatprep.subr.bf16.mxu0 %v1016_v1  ;;  %p992_p4 = por %p991_p3, %p990_p2 }
  0x2f   :  { %p993_p5 = pnand %p992_p4, %p986_p1 }
  0x31   :  { %70 = vbcast.lane.b32.xlu0 %v68_v8, 256 }
  0x9f   :  { %v64_v10 = vpop.permute.xlu0 %63 }
  0xa0   :  { %v1071_v13 = vmul.f32 %v64_v10, %v57_v11 }
  0xa3   :  { %v71_v12 = vpop.permute.xlu0 %70 }
  0xa4   :  { %v1073_v14 = vmul.f32 %v71_v12, %v57_v11 }
  0xa6   :  { %v79_v15 = vpack.c.bf16 %v1073_v14, %v1071_v13 }
  0xa8   :  { %834 = vmatmul.mubr.msk.bf16.vlgmr.msra.gmra.mxu0 %vm98_vm1, %v79_v15 }
  0xa9   :  { %845 = vmatprep.mubr.msk.bf16.mxu0 %vm1017_vm0, %v1016_v1 }
 0x168   :  { %v136_v17 = vpop.f32.mrf.mxu0 }
 0x169   :  { %v137_v18 = vadd.f32 %v789_v16, %v136_v17 }
 0x16a   :  { %v835_v19 = vpop.f32.mrf.mxu0 }
 0x16b   :  { %v143_v20 = vpack.c.bf16 %v137_v18, %v137_v18 }
 0x16c   :  { %v139_v21 = vpop.f32.mrf.mxu0 }
 0x16d   :  { %v140_v22 = vadd.f32 %v789_v16, %v139_v21  ;;  %146 = vrot.lane.b32.xlu1 %v143_v20, %s1018_s5 }
 0x16e   :  { %v836_v23 = vpop.f32.mrf.mxu0 }
 0x16f   :  { %v144_v24 = vpack.c.bf16 %v140_v22, %v140_v22 }
 0x171   :  { %195 = vrot.lane.b32.xlu1 %v144_v24, %s1018_s5 }
 0x1df   :  { %v147_v25 = vpop.permute.xlu1 %146 }
 0x1e0   :  { %v152_v26 = vsel %vm98_vm1, %v147_v25, 0 }
 0x1e1   :  { %838 = vmatpush3.bf16.xpose.msra.mxu1 %v152_v26 }
 0x1e2   :  { %849 = vmatprep.subr.bf16.mxu1 %v1016_v1 }
 0x1e3   :  { %v196_v27 = vpop.permute.xlu1 %195 }
 0x1e4   :  { %v201_v28 = vsel %vm98_vm1, %v196_v27, 0 }
 0x1e5   :  { %844 = vmatpush3.bf16.xpose.msra.mxu0 %v201_v28 }
 0x1e6   :  { %855 = vmatprep.subr.bf16.mxu0 %v1016_v1 }
 0x1e8   :  { %840 = vmatmul.mubr.msk.bf16.vlgmr.msra.gmra.mxu1 %vm98_vm1, %v143_v20 }
 0x1e9   :  { %851 = vmatprep.mubr.msk.bf16.mxu1 %vm1017_vm0, %v1016_v1 }
 0x1ec   :  { %846 = vmatmul.mubr.msk.bf16.vlgmr.msra.gmra.mxu0 %vm98_vm1, %v144_v24 }
 0x1ed   :  { %857 = vmatprep.mubr.msk.bf16.mxu0 %vm1017_vm0, %v1016_v1 }
 0x2a8   :  { %v188_v29 = vpop.f32.mrf.mxu1 }
 0x2a9   :  { %v243_v30 = vmul.f32 0.17677669, %v188_v29 }
 0x2aa   :  { %v841_v31 = vpop.f32.mrf.mxu1 }
 0x2ab   :  { %v246_v32 = vsel %vm245_vm2, %v243_v30, -inf }
 0x2ac   :  { %247 = vmax.xlane.f32.xlu0 %v246_v32  ;;  %v191_v33 = vpop.f32.mrf.mxu1  ;;  %v237_v34 = vpop.f32.mrf.mxu0 }
 0x2ad   :  { %v244_v35 = vmul.f32 0.17677669, %v237_v34 }
 0x2ae   :  { %v842_v36 = vpop.f32.mrf.mxu1  ;;  %v847_v37 = vpop.f32.mrf.mxu0 }
 0x2af   :  { %v249_v38 = vsel %vm245_vm2, %v244_v35, -inf }
 0x2b0   :  { %250 = vmax.xlane.f32.xlu1 %v249_v38  ;;  %v240_v39 = vpop.f32.mrf.mxu0 }
 0x2b2   :  { %v848_v40 = vpop.f32.mrf.mxu0 }
 0x2c1   :  { %270 = vrot.lane.b32.xlu1 %v143_v20, %s1014_s1 }
 0x335   :  { %v248_v41 = vpop.xlane.xlu0 %247 }
 0x336   :  { %v252_v42 = vsub.f32 %v243_v30, %v248_v41 }
 0x338   :  { %v254_v43 = vmul.f32 1.442695, %v252_v42 }
 0x339   :  { %v251_v44 = vpop.xlane.xlu1 %250 }
 0x33a   :  { %909 = vpow2.f32 %v254_v43  ;;  %v253_v45 = vsub.f32 %v244_v35, %v251_v44 }
 0x33c   :  { %v256_v46 = vmul.f32 1.442695, %v253_v45 }
 0x33d   :  { %v271_v47 = vpop.permute.xlu1 %270 }
 0x33e   :  { %911 = vpow2.f32 %v256_v46  ;;  %v277_v48 = vsel %vm275_vm3, %v271_v47, 0 }
 0x33f   :  { %850 = vmatpush3.bf16.msra.mxu1 %v277_v48 }
 0x340   :  { %861 = vmatprep.subr.bf16.mxu1 %v1016_v1 }
 0x347   :  { %v910_v49 = vpop.eup %909 }
 0x348   :  { %v258_v50 = vsel %vm245_vm2, %v910_v49, 0.0 }
 0x349   :  { %259 = vadd.xlane.f32.xlu0 %v258_v50 }
 0x34b   :  { %v912_v51 = vpop.eup %911 }
 0x34c   :  { %v261_v52 = vsel %vm245_vm2, %v912_v51, 0.0 }
 0x34d   :  { %262 = vadd.xlane.f32.xlu0 %v261_v52 }
 0x363   :  { %319 = vrot.lane.b32.xlu0 %v144_v24, %s1014_s1 }
 0x3d2   :  { %v260_v53 = vpop.xlane.xlu0 %259 }
 0x3d3   :  { %913 = vrcp.f32 %v260_v53 }
 0x3d6   :  { %v263_v54 = vpop.xlane.xlu0 %262 }
 0x3d7   :  { %915 = vrcp.f32 %v263_v54 }
 0x3da   :  { %v320_v55 = vpop.permute.xlu0 %319 }
 0x3db   :  { %v325_v56 = vsel %vm275_vm3, %v320_v55, 0 }
 0x3dc   :  { %856 = vmatpush3.bf16.msra.mxu0 %v325_v56 }
 0x3dd   :  { %869 = vmatprep.subr.bf16.mxu0 %v1016_v1 }
 0x3e0   :  { %v914_v57 = vpop.eup %913 }
 0x3e1   :  { %v266_v58 = vmul.f32 %v914_v57, %v910_v49 }
 0x3e3   :  { %v268_v59 = vpack.c.bf16 %v266_v58, %v266_v58 }
 0x3e4   :  { %v916_v60 = vpop.eup %915 }
 0x3e5   :  { %852 = vmatmul.mubr.msk.bf16.vlgmr.msra.gmra.mxu1 %vm245_vm2, %v268_v59  ;;  %v267_v61 = vmul.f32 %v916_v60, %v912_v51 }
 0x3e6   :  { %865 = vmatprep.mubr.msk.bf16.mxu1 %vm1017_vm0, %v1016_v1  ;;  %862 = vmatpush3.bf16.msra.mxu1 %v907_v63  ;;  %v1020_v63 = vmov 1934713408  }
 0x3e7   :  { %v269_v62 = vpack.c.bf16 %v267_v61, %v267_v61  ;;  %863 = vmatprep.subr.bf16.mxu1 %v1016_v1  ;;  %v1019_v61 = vmov 1983009808  }
 0x3e9   :  { %858 = vmatmul.mubr.msk.bf16.vlgmr.msra.gmra.mxu0 %vm245_vm2, %v269_v62  ;;  %v665_v62 = vunpack.c.l.s4 %v1019_v61 }
 0x3ea   :  { %871 = vmatprep.mubr.msk.bf16.mxu0 %vm1017_vm0, %v1016_v1  ;;  %864 = vmatpush3.bf16.msra.mxu1 %v908_v0  ;;  %v696_v0 = vunpack.c.l.s4 %v1020_v63 }
 0x3eb   :  { %875 = vmatprep.subr.bf16.mxu1 %v1016_v1 }
 0x4a5   :  { %v313_v3 = vpop.f32.mrf.mxu1 }
 0x4a6   :  { %v1114_v7 = vadd.f32 %v313_v3, %v1071_v13  ;;  %v798_v13 = vld [vmem:[%s1171_s3 + $0x1] ss:$0 sm:$0xff]  ;;  %v666_v3 = vunpack.c.0.s8 %v665_v62  ;;  %s1021_s3 = smov 32  }
 0x4a7   :  { %v853_v4 = vpop.f32.mrf.mxu1 }
 0x4a9   :  { %v316_v5 = vpop.f32.mrf.mxu1  ;;  %v361_v6 = vpop.f32.mrf.mxu0 }
 0x4aa   :  { %v1117_v8 = vadd.f32 %v361_v6, %v1073_v14  ;;  %v697_v6 = vunpack.c.0.s8 %v696_v0 }
 0x4ab   :  { %v854_v9 = vpop.f32.mrf.mxu1  ;;  %v859_v10 = vpop.f32.mrf.mxu0 }
 0x4ac   :  { %v376_v11 = vpack.c.bf16 %v1117_v8, %v1114_v7  ;;  %v669_v10 = vsub.s32 %v666_v3, %v1061_v2 }
 0x4ad   :  { %v364_v12 = vpop.f32.mrf.mxu0 }
 0x4ae   :  { %866 = vmatmul.mubr.msk.bf16.vlgmr.msra.gmra.mxu1 %vm98_vm1, %v376_v11 }
 0x4af   :  { %v860_v15 = vpop.f32.mrf.mxu0  ;;  %877 = vmatprep.mubr.msk.bf16.mxu1 %vm1017_vm0, %v1016_v1 }
 0x56e   :  { %v432_v16 = vpop.f32.mrf.mxu1 }
 0x56f   :  { %v433_v17 = vadd.f32 %v798_v13, %v432_v16 }
 0x570   :  { %v867_v14 = vpop.f32.mrf.mxu1 }
 0x571   :  { %v439_v18 = vpack.c.bf16 %v433_v17, %v433_v17  ;;  %v700_v17 = vsub.s32 %v697_v6, %v1061_v2 }
 0x572   :  { %v435_v19 = vpop.f32.mrf.mxu1 }
 0x573   :  { %v436_v20 = vadd.f32 %v798_v13, %v435_v19  ;;  %442 = vrot.lane.b32.xlu1 %v439_v18, %s1018_s5 }
 0x574   :  { %v868_v21 = vpop.f32.mrf.mxu1 }
 0x575   :  { %v440_v22 = vpack.c.bf16 %v436_v20, %v436_v20 }
 0x577   :  { %491 = vrot.lane.b32.xlu1 %v440_v22, %s1018_s5 }
 0x5e5   :  { %v443_v23 = vpop.permute.xlu1 %442 }
 0x5e6   :  { %v448_v24 = vsel %vm98_vm1, %v443_v23, 0 }
 0x5e7   :  { %870 = vmatpush3.bf16.xpose.msra.mxu0 %v448_v24 }
 0x5e8   :  { %881 = vmatprep.subr.bf16.mxu0 %v1016_v1 }
 0x5e9   :  { %v492_v25 = vpop.permute.xlu1 %491 }
 0x5ea   :  { %v497_v26 = vsel %vm98_vm1, %v492_v25, 0 }
 0x5eb   :  { %876 = vmatpush3.bf16.xpose.msra.mxu1 %v497_v26 }
 0x5ec   :  { %887 = vmatprep.subr.bf16.mxu1 %v1016_v1 }
 0x5ee   :  { %872 = vmatmul.mubr.msk.bf16.vlgmr.msra.gmra.mxu0 %vm98_vm1, %v439_v18 }
 0x5ef   :  { %883 = vmatprep.mubr.msk.bf16.mxu0 %vm1017_vm0, %v1016_v1 }
 0x5f2   :  { %878 = vmatmul.mubr.msk.bf16.vlgmr.msra.gmra.mxu1 %vm98_vm1, %v440_v22 }
 0x5f3   :  { %889 = vmatprep.mubr.msk.bf16.mxu1 %vm1017_vm0, %v1016_v1 }
 0x6ae   :  { %v484_v27 = vpop.f32.mrf.mxu0 }
 0x6af   :  { %v539_v28 = vmul.f32 0.17677669, %v484_v27 }
 0x6b0   :  { %v873_v29 = vpop.f32.mrf.mxu0 }
 0x6b1   :  { %v541_v30 = vsel %vm245_vm2, %v539_v28, -inf }
 0x6b2   :  { %v533_v31 = vpop.f32.mrf.mxu1  ;;  %542 = vmax.xlane.f32.xlu0 %v541_v30  ;;  %v487_v32 = vpop.f32.mrf.mxu0 }
 0x6b3   :  { %v540_v33 = vmul.f32 0.17677669, %v533_v31 }
 0x6b4   :  { %v874_v34 = vpop.f32.mrf.mxu0  ;;  %v879_v35 = vpop.f32.mrf.mxu1 }
 0x6b5   :  { %v544_v36 = vsel %vm245_vm2, %v540_v33, -inf }
 0x6b6   :  { %545 = vmax.xlane.f32.xlu1 %v544_v36  ;;  %v536_v37 = vpop.f32.mrf.mxu1 }
 0x6b8   :  { %v880_v38 = vpop.f32.mrf.mxu1 }
 0x6c7   :  { %565 = vrot.lane.b32.xlu1 %v439_v18, %s1014_s1 }
 0x73b   :  { %v543_v39 = vpop.xlane.xlu0 %542 }
 0x73c   :  { %v547_v40 = vsub.f32 %v539_v28, %v543_v39 }
 0x73e   :  { %v549_v41 = vmul.f32 1.442695, %v547_v40 }
 0x73f   :  { %v546_v42 = vpop.xlane.xlu1 %545 }
 0x740   :  { %917 = vpow2.f32 %v549_v41  ;;  %v548_v43 = vsub.f32 %v540_v33, %v546_v42 }
 0x742   :  { %v551_v44 = vmul.f32 1.442695, %v548_v43 }
 0x743   :  { %v566_v45 = vpop.permute.xlu1 %565 }
 0x744   :  { %919 = vpow2.f32 %v551_v44  ;;  %v571_v46 = vsel %vm275_vm3, %v566_v45, 0 }
 0x745   :  { %882 = vmatpush3.bf16.msra.mxu0 %v571_v46 }
 0x74d   :  { %v918_v47 = vpop.eup %917 }
 0x74e   :  { %v553_v48 = vsel %vm245_vm2, %v918_v47, 0.0 }
 0x74f   :  { %554 = vadd.xlane.f32.xlu0 %v553_v48 }
 0x751   :  { %v920_v49 = vpop.eup %919 }
 0x752   :  { %v556_v50 = vsel %vm245_vm2, %v920_v49, 0.0 }
 0x753   :  { %557 = vadd.xlane.f32.xlu0 %v556_v50 }
 0x769   :  { %613 = vrot.lane.b32.xlu0 %v440_v22, %s1014_s1 }
 0x7d8   :  { %v555_v51 = vpop.xlane.xlu0 %554 }
 0x7d9   :  { %921 = vrcp.f32 %v555_v51 }
 0x7dc   :  { %v558_v52 = vpop.xlane.xlu0 %557 }
 0x7dd   :  { %923 = vrcp.f32 %v558_v52 }
 0x7e0   :  { %v614_v53 = vpop.permute.xlu0 %613 }
 0x7e1   :  { %v619_v54 = vsel %vm275_vm3, %v614_v53, 0 }
 0x7e2   :  { %888 = vmatpush3.bf16.msra.mxu1 %v619_v54 }
 0x7e6   :  { %v922_v55 = vpop.eup %921 }
 0x7e7   :  { %v561_v56 = vmul.f32 %v922_v55, %v918_v47 }
 0x7e9   :  { %v563_v57 = vpack.c.bf16 %v561_v56, %v561_v56 }
 0x7ea   :  { %v924_v58 = vpop.eup %923 }
 0x7eb   :  { %884 = vmatmul.mubr.msk.bf16.vlgmr.msra.gmra.mxu0 %vm245_vm2, %v563_v57  ;;  %v562_v59 = vmul.f32 %v924_v58, %v920_v49 }
 0x7ed   :  { %v564_v60 = vpack.c.bf16 %v562_v59, %v562_v59 }
 0x7ef   :  { %890 = vmatmul.mubr.msk.bf16.vlgmr.msra.gmra.mxu1 %vm245_vm2, %v564_v60 }
 0x8ab   :  { %v607_v4 = vpop.f32.mrf.mxu0 }
 0x8ac   :  { %v661_v9 = vadd.f32 %v607_v4, %v1114_v7 }
 0x8ad   :  { %v885_v5 = vpop.f32.mrf.mxu0 }
 0x8ae   :  { %v663_v14 = vcombine.high %v661_v9, %v1016_v1  ;;  %v670_v18 = vrot.slane %v661_v9, %v669_v10 }
 0x8af   :  { %v610_v11 = vpop.f32.mrf.mxu0  ;;  %v655_v12 = vpop.f32.mrf.mxu1 }
 0x8b0   :  { %v662_v15 = vadd.f32 %v655_v12, %v1117_v8  ;;  %v677_v25 = vrot.slane %v663_v14, %v669_v10 }
 0x8b1   :  { %v886_v13 = vpop.f32.mrf.mxu0  ;;  %v891_v16 = vpop.f32.mrf.mxu1 }
 0x8b2   :  { %v678_v19 = vcombine.high %v662_v15, %v1016_v1  ;;  %v685_v20 = vrot.slane %v662_v15, %v669_v10 }
 0x8b3   :  { %v658_v21 = vpop.f32.mrf.mxu1 }
 0x8b4   :  { %v692_v22 = vrot.slane %v678_v19, %v669_v10  ;;  %v693_v23 = vcombine.low %v670_v18, %v685_v20  ;;  %v694_v7 = vcombine.high %v670_v18, %v685_v20 }
 0x8b5   :  { %v892_v24 = vpop.f32.mrf.mxu1 }
 0x8b6   :  { %v708_v26 = vrot.slane %v694_v7, %v700_v17  ;;  %v701_v27 = vrot.slane %v693_v23, %v700_v17  ;;  %v709_v28 = vcombine.low %v677_v25, %v692_v22  ;;  %v710_v2 = vcombine.high %v677_v25, %v692_v22 }
 0x8b8   :  { %734 = vrot.lane.b32.xlu0 %v708_v26, %s1014_s1  ;;  %v725_v8 = vcombine.high %v701_v27, %v1016_v1  ;;  %v726_v29 = vcombine.high %v708_v26, %v1016_v1  ;;  %v724_v30 = vrot.slane %v710_v2, %v700_v17  ;;  %v717_v31 = vrot.slane %v709_v28, %v700_v17 }
 0x8ba   :  { %730 = vrot.lane.b32.xlu1 %v725_v8, %s1021_s3  ;;  %v727_v32 = vcombine.high %v717_v31, %v1016_v1  ;;  %v728_v33 = vcombine.high %v724_v30, %v1016_v1 }
 0x8bc   :  { %738 = vrot.lane.b32.xlu0 %v726_v29, %s1018_s5 }
 0x8be   :  { %746 = vrot.lane.b32.xlu1 %v724_v30, %s1014_s1 }
 0x8c2   :  { %742 = vrot.lane.b32.xlu1 %v727_v32, %s1021_s3 }
 0x8c6   :  { %750 = vrot.lane.b32.xlu1 %v728_v33, %s1018_s5 }
 0x92a   :  { %v735_v35 = vpop.permute.xlu0 %734 }
 0x92c   :  { %v731_v34 = vpop.permute.xlu1 %730 }
 0x92d   :  { %v753_v37 = vsel %vm98_vm1, %v701_v27, %v731_v34 }
 0x92e   :  { %v739_v40 = vpop.permute.xlu0 %738  ;;  %v755_v41 = vsel %vm754_vm4, %v753_v37, %v735_v35 }
 0x92f   :  { %v757_v44 = vsel %vm756_vm5, %v755_v41, %v739_v40 }
 0x930   :  { %v747_v36 = vpop.permute.xlu1 %746 }
 0x934   :  { %v743_v38 = vpop.permute.xlu1 %742 }
 0x935   :  { %v758_v39 = vsel %vm98_vm1, %v717_v31, %v743_v38 }
 0x936   :  { %v759_v42 = vsel %vm754_vm4, %v758_v39, %v747_v36 }
 0x938   :  { %v751_v43 = vpop.permute.xlu1 %750 }
 0x939   :  { %v760_v1 = vsel %vm756_vm5, %v759_v42, %v751_v43 }
 0x93a   :  { %v763_v45 = vcombine.low %v757_v44, %v760_v1 }
 0x93c   :  { %806 = vst.sshfl [vmem:[#allocation8] sm:$0x33 pattern:$0x76325410] %v763_v45 }
 0x93d   :  { %996 = shalt.err (!%p993_p5)
}
 0x93e   :  { %782 = dma.vmem_to_hbm [thread:$0]  %s780_s9, 64, %s1172_s4, [#allocation4]  }
 0x93f   :  { %1009 = dma.done.wait [#allocation4], 64  }
 0x940   :  { %1010 = vsyncadd [#allocation4], 4294967232 }
 0x941   :  { %786 = vsyncpa [#allocation3], 1 }
 0x942   :  { %787 = vsyncpa [#allocation6], 1 }
 0x943   :  { %788 = vsyncpa [#allocation4], 1 }

</bundles_post_ra>
